<compile_context>
chip_gen: v7x
topology: tpu7x:2x2x1
jax: 0.10.0
libtpu: 0.0.40
codegen_flags: <defaults>
</compile_context>

<pallas_src>
import functools

import numpy as np
import jax
import jax.numpy as jnp
from jax.experimental import pallas as pl
from jax.experimental.pallas import tpu as pltpu


# ----------------------------- Pallas kernel ------------------------------- #
def translate_kernel(x_ref, w_ref, p_ref, o_ref, *, n_chunks, q):
    """One grid step: n_chunks chunks of 4*q input rows -> n_chunks*q out rows.

    x_ref : (n_chunks*4*q, Cin_pad) bf16  rows ordered (chunk, dh, dw, ho, wo)
    w_ref : (Cin_pad, C_pad)        bf16  1x1 conv weight, BN-1 scale folded in
    p_ref : (3, C_pad)              f32   [BN-1 bias; BN-2 scale*0.25; BN-2 bias]
    o_ref : (n_chunks*q, C_pad)     bf16
    """
    # Hoist the per-channel params once (JAX does not CSE broadcast_in_dim).
    b1 = p_ref[0:1, :]
    s2 = p_ref[1:2, :]
    b2 = p_ref[2:3, :]

    # 1x1 conv == one MXU matmul over the whole tile, f32 accumulation.
    y = jnp.dot(x_ref[...], w_ref[...], preferred_element_type=jnp.float32)
    y = y + b1                        # BN-1 (scale already folded into weight)
    y = y * jax.nn.sigmoid(y)         # SiLU

    # 2x2 / stride-2 average pool on the VPU: the four pool taps of each output
    # pixel are contiguous q-row blocks inside each chunk -> one vectorized
    # tap-sum for the whole tile and a single lane-dense store.
    c = y.shape[-1]
    psum = y.reshape(n_chunks, 4, q, c).sum(axis=1).reshape(n_chunks * q, c)
    o_ref[...] = (psum * s2 + b2).astype(o_ref.dtype)   # BN-2 (1/4 folded in s2)


# ------------------------------- Helpers ------------------------------------ #
def _round_up(x, m):
    return ((x + m - 1) // m) * m


def _fold_bn(gamma, beta, rmean, rvar, eps=1e-5):
    scale = gamma / jnp.sqrt(rvar + eps)
    bias = beta - rmean * scale
    return scale, bias


def _tpu_vmem_capacity_bytes():
    """Physical VMEM per TensorCore; conservative fallback if unqueryable."""
    try:
        info = pltpu.get_tpu_info()
        cap = getattr(info, "vmem_capacity_bytes", None)
        if cap:
            return int(cap)
    except Exception:
        pass
    return 64 << 20          # v7x-sized fallback (smallest recent generation)


def _vmem_footprint_bytes(m_rows, cin_pad, c_pad):
    """Per-grid-step VMEM need: double-buffered x/out tiles + weight + params."""
    mo_rows = m_rows // 4
    return (2 * m_rows * cin_pad * 2        # x tile, bf16, 2 buffers
            + 2 * mo_rows * c_pad * 2       # out tile, bf16, 2 buffers
            + 2 * cin_pad * c_pad * 2       # weight, bf16 (conservatively x2)
            + 2 * 8 * c_pad * 4)            # (3,C) params, sublane-padded to 8


def _pick_tiling(N, Ho, Wo, cin_pad, c_pad, target_rows, vmem_budget):
    """Pick (ho_blk, chunks_per_tile).

    A chunk is one (image, output-row-block) pair: 4*ho_blk*Wo input rows and
    q = ho_blk*Wo output rows, with the four pool taps in contiguous q-row
    blocks.  Constraints: q multiple of 8 (sublane-aligned blocks), per-step
    footprint within the VMEM budget, and >= 2 grid steps whenever >= 2 chunks
    exist (so the "parallel" grid axis can use both v7x TensorCores).
    """
    candidates = []
    for ho_blk in range(1, Ho + 1):
        if Ho % ho_blk:
            continue
        q = ho_blk * Wo
        if q % 8:
            continue
        hb = Ho // ho_blk
        total_chunks = N * hb
        cpt_cap = total_chunks if total_chunks < 2 else total_chunks // 2
        for cpt in range(1, total_chunks + 1):
            if total_chunks % cpt or cpt > cpt_cap:
                continue
            m_rows = cpt * 4 * q
            if _vmem_footprint_bytes(m_rows, cin_pad, c_pad) > vmem_budget:
                continue
            candidates.append((m_rows <= target_rows, m_rows, ho_blk, cpt))
    if not candidates:
        return Ho, 1                    # tiny/odd shapes: one image per step
    within = [c for c in candidates if c[0]]
    if within:
        # biggest tile within the row target (tie-break: larger ho_blk)
        _, _, ho_blk, cpt = max(within, key=lambda c: (c[1], c[2]))
    else:
        # nothing fits the target: smallest valid tile that fits VMEM
        _, _, ho_blk, cpt = max(candidates, key=lambda c: (-c[1], c[2]))
    return ho_blk, cpt


# ------------------------------- Wrapper ------------------------------------ #
def translate_layer_pallas(x_nchw, params, eps=1e-5, target_rows=4096):
    """x_nchw: (N, Cin, H, W) float32 -> (N, Cout, H//2, W//2) float32."""
    N, Cin, H, W = x_nchw.shape
    Cout = params["w"].shape[0]
    assert H % 2 == 0 and W % 2 == 0
    Ho, Wo = H // 2, W // 2

    c_pad = _round_up(Cout, 128)        # 192 -> 256: lane-dense output stores
    cin_pad = _round_up(Cin, 128)

    # ---- fold BN params ------------------------------------------------------
    s1, b1 = _fold_bn(params["g1"], params["be1"], params["rm1"], params["rv1"], eps)
    s2, b2 = _fold_bn(params["g2"], params["be2"], params["rm2"], params["rv2"], eps)

    # BN-1 scale folded into the 1x1 conv weight; 1/4 pool factor folded into s2.
    w = jnp.transpose(params["w"], (1, 0)) * s1[None, :]           # (Cin, Cout)
    w = jnp.pad(w, ((0, cin_pad - Cin), (0, c_pad - Cout))).astype(jnp.bfloat16)
    pstack = jnp.stack([
        jnp.pad(b1, (0, c_pad - Cout)),
        jnp.pad(s2 * 0.25, (0, c_pad - Cout)),
        jnp.pad(b2, (0, c_pad - Cout)),
    ]).astype(jnp.float32)                                          # (3, c_pad)

    # ---- tiling (VMEM-budgeted, keeps >=2 grid steps when possible) ----------
    vmem_cap = _tpu_vmem_capacity_bytes()
    ho_blk, cpt = _pick_tiling(N, Ho, Wo, cin_pad, c_pad,
                               target_rows, vmem_budget=vmem_cap // 2)
    hb = Ho // ho_blk                  # output-row blocks per image
    q = ho_blk * Wo                    # output rows per chunk
    m_tile = cpt * 4 * q               # matmul rows per grid step
    mo_tile = cpt * q                  # output rows per grid step
    n_steps = (N * hb) // cpt

    # ---- re-order input: rows (n, ho_block, dh, dw, ho_in_block, wo), channels
    #      last, so every output pixel's 4 pool taps are contiguous row blocks.
    xr = x_nchw.reshape(N, Cin, hb, ho_blk, 2, Wo, 2)   # (n,c,hb,ho,dh,wo,dw)
    xt = jnp.transpose(xr, (0, 2, 4, 6, 3, 5, 1))       # (n,hb,dh,dw,ho,wo,c)
    x2 = xt.reshape(N * H * W, Cin)
    if cin_pad != Cin:
        x2 = jnp.pad(x2, ((0, 0), (0, cin_pad - Cin)))
    x2 = x2.astype(jnp.bfloat16)       # bf16 MXU operands, f32 accumulation

    vmem_limit = int(min(
        int(vmem_cap * 0.9),
        max(32 << 20, 2 * _vmem_footprint_bytes(m_tile, cin_pad, c_pad)),
    ))

    kernel = functools.partial(translate_kernel, n_chunks=cpt, q=q)
    out = pl.pallas_call(
        kernel,
        out_shape=jax.ShapeDtypeStruct((N * Ho * Wo, c_pad), jnp.bfloat16),
        grid_spec=pltpu.PrefetchScalarGridSpec(
            num_scalar_prefetch=0,
            grid=(n_steps,),
            in_specs=[
                pl.BlockSpec((m_tile, cin_pad), lambda i: (i, 0)),
                # grid-invariant operands (constant index_map -> no re-fetch):
                pl.BlockSpec((cin_pad, c_pad), lambda i: (0, 0)),
                pl.BlockSpec((3, c_pad), lambda i: (0, 0)),
            ],
            out_specs=pl.BlockSpec((mo_tile, c_pad), lambda i: (i, 0)),
        ),
        compiler_params=pltpu.CompilerParams(
            dimension_semantics=("parallel",),
            vmem_limit_bytes=vmem_limit,
        ),
    )(x2, w, pstack)

    # (N*Ho*Wo, C_pad) bf16 -> (N, Cout, Ho, Wo) f32
    out = out[:, :Cout].astype(jnp.float32).reshape(N, Ho, Wo, Cout)
    # TODO(synk): in an all-NHWC pipeline this slice+transpose (and the input
    # reorder above) disappear; they currently move more HBM bytes than the
    # kernel itself.
    return jnp.transpose(out, (0, 3, 1, 2))


# ----------------------------- JAX reference -------------------------------- #
def translate_layer_ref(x_nchw, params, eps=1e-5):
    w = params["w"]                                              # (Cout, Cin)
    y = jnp.einsum("nchw,oc->nohw", x_nchw, w)
    y = (y - params["rm1"][None, :, None, None]) / jnp.sqrt(
        params["rv1"][None, :, None, None] + eps
    ) * params["g1"][None, :, None, None] + params["be1"][None, :, None, None]
    y = y * jax.nn.sigmoid(y)                                    # SiLU
    N, C, H, W = y.shape
    y = y.reshape(N, C, H // 2, 2, W // 2, 2).mean(axis=(3, 5))  # AvgPool2d(2,2)
    y = (y - params["rm2"][None, :, None, None]) / jnp.sqrt(
        params["rv2"][None, :, None, None] + eps
    ) * params["g2"][None, :, None, None] + params["be2"][None, :, None, None]
    return y


# --------------------------------- main ------------------------------------- #
if __name__ == "__main__":
    # Small shapes consistent with the module (default in_channels=864 shrunk).
    N, Cin, H, W = 2, 256, 8, 8
    Cout = 192

    key = jax.random.PRNGKey(0)
    ks = jax.random.split(key, 10)
    params = {
        # conv_0 weight: (Cout, Cin) == PyTorch (Cout, Cin, 1, 1) squeezed
        "w": jax.random.normal(ks[0], (Cout, Cin), jnp.float32) * 0.05,
        # BN inside Conv2d_bn
        "g1": 1.0 + 0.1 * jax.random.normal(ks[1], (Cout,), jnp.float32),
        "be1": 0.1 * jax.random.normal(ks[2], (Cout,), jnp.float32),
        "rm1": 0.1 * jax.random.normal(ks[3], (Cout,), jnp.float32),
        "rv1": 1.0 + 0.1 * jax.nn.softplus(jax.random.normal(ks[4], (Cout,), jnp.float32)),
        # bn_0 after the pool
        "g2": 1.0 + 0.1 * jax.random.normal(ks[5], (Cout,), jnp.float32),
        "be2": 0.1 * jax.random.normal(ks[6], (Cout,), jnp.float32),
        "rm2": 0.1 * jax.random.normal(ks[7], (Cout,), jnp.float32),
        "rv2": 1.0 + 0.1 * jax.nn.softplus(jax.random.normal(ks[8], (Cout,), jnp.float32)),
    }

    x = jax.random.normal(ks[9], (N, Cin, H, W), jnp.float32)

    out = jax.block_until_ready(translate_layer_pallas(x, params))
    ref = jax.block_until_ready(translate_layer_ref(x, params))

    assert out.shape == (N, Cout, H // 2, W // 2), out.shape
    # bf16 matmul operands + bf16 output store (f32 accumulation & epilogue).
    np.testing.assert_allclose(np.asarray(out), np.asarray(ref), rtol=3e-2, atol=3e-2)

    print("KERNEL_OK")
</pallas_src>

<mosaic_0001>
module attributes {stable_mosaic.version = 11 : i64} {
  func.func @translate_kernel(%arg0: i32, %arg1: memref<64x256xbf16, #tpu.memory_space<vmem>>, %arg2: memref<256x256xbf16, #tpu.memory_space<vmem>>, %arg3: memref<3x256xf32, #tpu.memory_space<vmem>>, %arg4: memref<16x256xbf16, #tpu.memory_space<vmem>>) attributes {dimension_semantics = [#tpu.dimension_semantics<parallel>], iteration_bounds = array<i64: 2>, scalar_prefetch = 0 : i64, scratch_operands = 0 : i64, tpu.core_type = #tpu.core_type<tc>, window_params = [{transform_indices = @transform_0, window_bounds = array<i64: 64, 256>}, {pipeline_mode = #tpu.pipeline_mode<synchronous>, transform_indices = @transform_1, window_bounds = array<i64: 256, 256>}, {pipeline_mode = #tpu.pipeline_mode<synchronous>, transform_indices = @transform_2, window_bounds = array<i64: 3, 256>}, {transform_indices = @transform_3, window_bounds = array<i64: 16, 256>}]} {
    %c0 = arith.constant 0 : index
    %c0_0 = arith.constant 0 : index
    %0 = vector.load %arg3[%c0, %c0_0] : memref<3x256xf32, #tpu.memory_space<vmem>>, vector<1x256xf32>
    %c1 = arith.constant 1 : index
    %c0_1 = arith.constant 0 : index
    %1 = vector.load %arg3[%c1, %c0_1] : memref<3x256xf32, #tpu.memory_space<vmem>>, vector<1x256xf32>
    %c2 = arith.constant 2 : index
    %c0_2 = arith.constant 0 : index
    %2 = vector.load %arg3[%c2, %c0_2] : memref<3x256xf32, #tpu.memory_space<vmem>>, vector<1x256xf32>
    %c0_3 = arith.constant 0 : index
    %c0_4 = arith.constant 0 : index
    %3 = vector.load %arg1[%c0_3, %c0_4] : memref<64x256xbf16, #tpu.memory_space<vmem>>, vector<64x256xbf16>
    %c0_5 = arith.constant 0 : index
    %c0_6 = arith.constant 0 : index
    %4 = vector.load %arg2[%c0_5, %c0_6] : memref<256x256xbf16, #tpu.memory_space<vmem>>, vector<256x256xbf16>
    %cst = arith.constant dense<0.000000e+00> : vector<64x256xf32>
    %5 = tpu.matmul %3, %4, %cst {dimension_numbers = #tpu.dot_dimension_numbers<[1], [0], [0], [1], [0, 0, 1, 1], [], []>} : vector<64x256xbf16>, vector<256x256xbf16>, vector<64x256xf32> -> vector<64x256xf32>
    %6 = vector.broadcast %0 : vector<1x256xf32> to vector<64x256xf32>
    %7 = arith.addf %5, %6 : vector<64x256xf32>
    %8 = arith.negf %7 : vector<64x256xf32>
    %9 = math.exp %8 : vector<64x256xf32>
    %cst_7 = arith.constant 1.000000e+00 : f32
    %10 = vector.broadcast %cst_7 : f32 to vector<64x256xf32>
    %11 = arith.addf %10, %9 : vector<64x256xf32>
    %12 = arith.divf %10, %11 : vector<64x256xf32>
    %13 = arith.mulf %7, %12 : vector<64x256xf32>
    %14 = vector.shape_cast %13 : vector<64x256xf32> to vector<1x4x16x256xf32>
    %cst_8 = arith.constant dense<0.000000e+00> : vector<1x16x256xf32>
    %15 = vector.multi_reduction <add>, %14, %cst_8 [1] : vector<1x4x16x256xf32> to vector<1x16x256xf32>
    %16 = vector.shape_cast %15 : vector<1x16x256xf32> to vector<16x256xf32>
    %17 = vector.broadcast %1 : vector<1x256xf32> to vector<16x256xf32>
    %18 = arith.mulf %16, %17 : vector<16x256xf32>
    %19 = vector.broadcast %2 : vector<1x256xf32> to vector<16x256xf32>
    %20 = arith.addf %18, %19 : vector<16x256xf32>
    %21 = arith.truncf %20 : vector<16x256xf32> to vector<16x256xbf16>
    %c0_9 = arith.constant 0 : index
    %c0_10 = arith.constant 0 : index
    %22 = vector.load %arg4[%c0_9, %c0_10] : memref<16x256xbf16, #tpu.memory_space<vmem>>, vector<16x256xbf16>
    tpu.vector_store %arg4[%c0_9, %c0_10], %21 {strides = array<i32>} : memref<16x256xbf16, #tpu.memory_space<vmem>>, vector<16x256xbf16>,
    return
  }
  func.func @transform_0(%arg0: i32) -> (i32, i32) {
    %c0_i32 = arith.constant 0 : i32
    %c0_i32_0 = arith.constant 0 : i32
    return %arg0, %c0_i32 : i32, i32
  }
  func.func @transform_1(%arg0: i32) -> (i32, i32) {
    %c0_i32 = arith.constant 0 : i32
    %c0_i32_0 = arith.constant 0 : i32
    %c0_i32_1 = arith.constant 0 : i32
    return %c0_i32, %c0_i32_0 : i32, i32
  }
  func.func @transform_2(%arg0: i32) -> (i32, i32) {
    %c0_i32 = arith.constant 0 : i32
    %c0_i32_0 = arith.constant 0 : i32
    %c0_i32_1 = arith.constant 0 : i32
    return %c0_i32, %c0_i32_0 : i32, i32
  }
  func.func @transform_3(%arg0: i32) -> (i32, i32) {
    %c0_i32 = arith.constant 0 : i32
    %c0_i32_0 = arith.constant 0 : i32
    return %arg0, %c0_i32 : i32, i32
  }
}

</mosaic_0001>

<bundles_post_ra>
// kernel: tpu_custom_call.1
= control target key start
LH: loop header
LB: loop body
LE: loop exit
PB: predicated region body
PF: predicated region fallthrough
CT: control target
= control target key end

     0   :  { %8 = vsyncpa [#allocation3], 0  ;;  %s1665_s0 = inlined_call_operand.hbm [shape: bf16[128,256], index: 0, kind: input, shape index: {}]   ;;  %s1666_s1 = inlined_call_operand.hbm [shape: bf16[256,256], index: 1, kind: input, shape index: {}]   ;;  %s1667_s2 = inlined_call_operand.hbm [shape: f32[3,256], index: 2, kind: input, shape index: {}]   ;;  %s1668_s3 = inlined_call_operand.hbm [shape: bf16[32,256], index: 3, kind: output, shape index: {}]  }
   0x1   :  { %10 = vsyncpa [#allocation3 + $0x1], 0 }
   0x2   :  { %11 = vsyncpa [#allocation6], 0 }
   0x3   :  { %12 = vsyncpa [#allocation4], 0 }
   0x4   :  { %14 = vsyncpa [#allocation4 + $0x1], 0  ;;  %s1320_s12 = smov 0   ;;  %s1322_s13 = smov 0  }
   0x5   :  { %s1324_s14 = smov 0   ;;  %s1326_s15 = smov 0  }
   0x6 LB: > { %s1341_s16 = sadd.s32 4294967295, %s1290_s15   ;;  %s823_s17 = sadd.s32 4294967294, %s1290_s15   ;;  %s1290_s15 = sphi %s1326_s15, %s1688_s15   ;;  %s1286_s14 = sphi %s1324_s14, %s1687_s14   ;;  %s1282_s13 = sphi %s1322_s13, %s1686_s13   ;;  %s1278_s12 = sphi %s1320_s12, %s1685_s12  }
   0x7   : > { %p40_p0 = scmp.ne.s32.totalorder %s1282_s13, %s1278_s12  ;;  %p1669_p1 = scmp.eq.s32.totalorder %s1341_s16, 0 }
   0x8   : > { %p112_p3 = scmp.eq.s32.totalorder %s823_s17, 1  ;;  %p824_p5 = scmp.ge.s32.totalorder %s1290_s15, 1 }
   0x9   : > { %p1350_p4 = por %p1669_p1, %p40_p0  ;;  %p119_p7 = scmp.lt.s32.totalorder %s1290_s15, 3 }
   0xa   : > { %p1355_p6 = por %p112_p3, %p40_p0  ;;  %s1292_s21 = smov [#allocation5]  }
   0xb   : > { %s1672_s18 = scalar_select %p1350_p4, 1, 0 }
   0xc   : > { %s1673_s19 = scalar_select %p1355_p6, 1, 0 }
   0xd   : > { %p1360_p8 = pnand %p824_p5, %p119_p7  ;;  %s131_s22 = sshll.u32 %s1292_s21, 4  ;;  %s1364_s22 = int_to_ptr.vmem [resolvable:$true] %s131_s22 }
   0xe   : > { %s1293_s24 = smov [#allocation7]   ;;  %s1134_s28 = scalar_lea.hbm %s1666_s1, 4096 }
   0xf   : > { %p951_p9 = pneg %p1360_p8  ;;  %s145_s25 = sshll.u32 %s1293_s24, 4  ;;  %s1375_s25 = int_to_ptr.vmem [resolvable:$true] %s145_s25 }
  0x10   : > { %p1135_p12 = scmp.ne.s32.totalorder %s1666_s1, %s1134_s28  ;;  %p1141_p5 = scmp.lt.u32.totalorder %s1134_s28, %s1666_s1 }
  0x11   : > { %p1371_p11 = pnand %p951_p9, %p1669_p1 }
  0x13   : > { %p1136_p13 = pneg %p1371_p11 }
  0x15   : > { %p1137_p0 = pnand %p1136_p13, %p1135_p12 }
  0x17   : > { %p1138_p3 = pneg %p1137_p0 }
  0x19   : > { %p1143_p7 = pnand %p1141_p5, %p1138_p3 }
  0x1b   : > { %1146 = shalt.err (!%p1143_p7)
}
  0x1c   : > { %s1147_s6 = scalar_lea.vmem %s1364_s22, 4096  ;;  %p1155_p2 = scmp.lt.s32.totalorder %s1364_s22, %s1364_s22 }
  0x1d   : > { %p1148_p9 = scmp.ne.s32.totalorder %s1364_s22, %s1147_s6  ;;  %p1156_p12 = scmp.lt.s32.totalorder %s1147_s6, %s1147_s6 }
  0x1f   : > { %p1150_p10 = pnand %p1148_p9, %p1136_p13  ;;  %p1157_p0 = por %p1156_p12, %p1155_p2 }
  0x21   : > { %p1151_p1 = pneg %p1150_p10 }
  0x23   : > { %p1158_p6 = pnand %p1157_p0, %p1151_p1 }
  0x25   : > { %1161 = shalt.err (!%p1158_p6)
}
  0x26   : > { %s1294_s7 = smov 128   ;;  %s1295_s8 = smov 8  }
  0x27   : > { %954 = dma.hbm_to_vmem [thread:$0]  (!%p1371_p11), %s1666_s1, 4096, %s1364_s22, [#allocation6], %s1294_s7, %s1294_s7, %s1295_s8  }
  0x28   : > { %s1162_s21 = scalar_lea.hbm %s1667_s2, 128 }
  0x29   : > { %p1163_p1 = scmp.ne.s32.totalorder %s1667_s2, %s1162_s21  ;;  %p1169_p10 = scmp.lt.u32.totalorder %s1162_s21, %s1667_s2 }
  0x2b   : > { %p1165_p2 = pnand %p1163_p1, %p1136_p13 }
  0x2d   : > { %p1166_p6 = pneg %p1165_p2 }
  0x2f   : > { %p1171_p3 = pnand %p1169_p10, %p1166_p6 }
  0x31   : > { %1174 = shalt.err (!%p1171_p3)
}
  0x32   : > { %s1175_s22 = scalar_lea.vmem %s1375_s25, 128  ;;  %p1183_p12 = scmp.lt.s32.totalorder %s1375_s25, %s1375_s25 }
  0x33   : > { %p1176_p5 = scmp.ne.s32.totalorder %s1375_s25, %s1175_s22  ;;  %p1184_p0 = scmp.lt.s32.totalorder %s1175_s22, %s1175_s22 }
  0x35   : > { %p1178_p7 = pnand %p1176_p5, %p1136_p13  ;;  %p1185_p1 = por %p1184_p0, %p1183_p12 }
  0x37   : > { %p1179_p9 = pneg %p1178_p7 }
  0x39   : > { %p1186_p2 = pnand %p1185_p1, %p1179_p9 }
  0x3b   : > { %1189 = shalt.err (!%p1186_p2)
}
  0x3c   : > { %957 = dma.hbm_to_vmem [thread:$0]  (!%p1371_p11), %s1667_s2, 128, %s1375_s25, [#allocation6]  }
  0x3d   : > { %s1433_s4 = sadd.s32 1, %s1290_s15   ;;  %s27_s23 = sadd.s32 1, %s1286_s14 }
  0x3e   : > { %s24_s5 = ssub.s32 %s1290_s15, %s1433_s4  ;;  %p34_p13 = scmp.ne.s32.totalorder %s1286_s14, %s1282_s13 }
  0x3f   : > { %p25_p6 = scmp.eq.s32.totalorder %s24_s5, 0  ;;  %p35_p10 = scmp.eq.s32.totalorder %s1290_s15, 0 }
  0x40   : > { %p1676_p3 = scmp.eq.s32.totalorder %s1341_s16, 1  ;;  %p968_p7 = scmp.lt.s32.totalorder %s1290_s15, 2 }
  0x41   : > { %s1449_s9 = scalar_select %p25_p6, %s1286_s14, %s27_s23  }
  0x42   : > { %p1443_p5 = por %p1676_p3, %p34_p13  ;;  %p36_p9 = por %p35_p10, %p34_p13 }
  0x43   : > { %s156_s10 = sand.u32 1, %s1286_s14   ;;  %s902_s25 = sshll.u32 %s1290_s15, 10 }
  0x44   : > { %s1677_s6 = scalar_select %p1443_p5, 1, 0 }
  0x45   : > { %s828_s11 = sshll.u32 %s156_s10, 6  ;;  %s1456_s24 = scalar_lea.hbm %s1665_s0, %s902_s25 }
  0x46   : > { %s160_s26 = scalar_lea.vmem [#allocation2], %s828_s11  ;;  %p1460_p11 = pnand %p968_p7, %p36_p9 }
  0x47   : > { %s168_s27 = sshll.u32 %s160_s26, 4  ;;  %s1464_s22 = scalar_lea.sflag [#allocation3], %s156_s10  ;;  %s1458_s27 = int_to_ptr.vmem [resolvable:$true] %s168_s27 }
  0x48   : > { %s1190_s29 = scalar_lea.hbm %s1456_s24, 1024  ;;  %p1192_p0 = pneg %p1460_p11 }
  0x49   : > { %p1191_p12 = scmp.ne.s32.totalorder %s1456_s24, %s1190_s29  ;;  %s1195_s5 = scalar_lea.hbm %s1665_s0, 2048 }
  0x4a   : > { %p1196_p13 = scmp.lt.u32.totalorder %s1456_s24, %s1665_s0  ;;  %p1197_p6 = scmp.lt.u32.totalorder %s1195_s5, %s1190_s29 }
  0x4b   : > { %p1193_p1 = pnand %p1192_p0, %p1191_p12  ;;  %p1199_p3 = scmp.lt.u32.totalorder %s1190_s29, %s1456_s24 }
  0x4c   : > { %p1198_p10 = por %p1197_p6, %p1196_p13 }
  0x4d   : > { %p1194_p2 = pneg %p1193_p1 }
  0x4e   : > { %p1200_p7 = por %p1199_p3, %p1198_p10 }
  0x50   : > { %p1201_p9 = pnand %p1200_p7, %p1194_p2 }
  0x52   : > { %1204 = shalt.err (!%p1201_p9)
}
  0x53   : > { %s1205_s10 = scalar_lea.vmem %s1458_s27, 1024  ;;  %s1296_s17 = smov [#allocation2]  }
  0x54   : > { %p1206_p12 = scmp.ne.s32.totalorder %s1458_s27, %s1205_s10  ;;  %s1210_s21 = sshll.u32 %s1296_s17, 4  ;;  %s1211_s21 = int_to_ptr.vmem [resolvable:$false] %s1210_s21 }
  0x55   : > { %s1212_s26 = scalar_lea.vmem %s1211_s21, 2048  ;;  %p1213_p4 = scmp.lt.s32.totalorder %s1458_s27, %s1211_s21 }
  0x56   : > { %p1208_p1 = pnand %p1206_p12, %p1192_p0  ;;  %p1214_p13 = scmp.lt.s32.totalorder %s1212_s26, %s1205_s10 }
  0x58   : > { %p1209_p5 = pneg %p1208_p1  ;;  %p1215_p6 = por %p1214_p13, %p1213_p4 }
  0x5a   : > { %p1216_p10 = pnand %p1215_p6, %p1209_p5 }
  0x5c   : > { %1219 = shalt.err (!%p1216_p10)
}
  0x5d   : > { %961 = dma.hbm_to_vmem [thread:$0]  (!%p1460_p11), %s1456_s24, 1024, %s1458_s27, %s1464_s22, %s1294_s7, %s1294_s7, %s1295_s8  }
  0x5e   : > { %180 = sbr.rel (%p1360_p8) target bundleno = 466 (0x1d2), region = 32  ;;  %s1498_s29 = sand.u32 (!%p1360_p8), 1, %s1282_s13  }
  0x5f   : > { %s833_s30 = sshll.u32 (!%p1360_p8), %s1498_s29, 6  ;;  %s183_s23 = scalar_lea.sflag (!%p1360_p8), [#allocation3], %s1498_s29 }
  0x60   : > { %s1502_s5 = scalar_lea.vmem (!%p1360_p8), [#allocation2], %s833_s30  ;;  %p1679_p4 = scmp.ne.s32.totalorder (!%p1360_p8), %s1672_s18, 0 }
  0x65   : > { %1265 = dma.done.wait (%p1679_p4), %s183_s23, 1024  }
  0x66   : > { %1267 = vsyncadd (%p1679_p4), %s183_s23, 4294966272  ;;  %p1680_p5 = scmp.eq.s32.totalorder %s1341_s16, 0 }
  0x68   : > { %1269 = dma.done.wait (%p1680_p5), [#allocation6], 4224   ;;  %p1681_p8 = pmov %p1680_p5 }
  0x69   : > { %v1010_v0 = vld [vmem:[#allocation5 + $0x4] ss:$8 sps:$4 sm:$0xff]   ;;  %v1012_v1 = vld [vmem:[#allocation5] ss:$8 sps:$4 sm:$0xff]   ;;  %v1013_v2 = vld [vmem:[#allocation5 + $0x14] ss:$8 sps:$4 sm:$0xff]   ;;  %v265_v40 = vlaneseq }
  0x6a   : > { %1271 = vsyncadd (%p1681_p8), [#allocation6], 4294963072  ;;  %475 = vmatprep.subr.bf16.mxu0 %v1010_v0  ;;  %907 = vmatprep.subr.bf16.mxu1 %v1010_v0  ;;  %v1015_v3 = vld [vmem:[#allocation5 + $0x10] ss:$8 sps:$4 sm:$0xff]   ;;  %v1016_v4 = vld [vmem:[#allocation5 + $0x24] ss:$8 sps:$4 sm:$0xff]  }
  0x6b   : > { %476 = vmatpush1.bf16.msra.mxu0 %v1012_v1  ;;  %923 = vmatpush1.bf16.msra.mxu1 %v1012_v1  ;;  %v1018_v5 = vld [vmem:[#allocation5 + $0x20] ss:$8 sps:$4 sm:$0xff]   ;;  %v1019_v6 = vld [vmem:[#allocation5 + $0x34] ss:$8 sps:$4 sm:$0xff]   ;;  %v1021_v7 = vld [vmem:[#allocation5 + $0x30] ss:$8 sps:$4 sm:$0xff]  }
  0x6c   : > { %477 = vmatprep.subr.bf16.mxu0 %v1013_v2  ;;  %908 = vmatprep.subr.bf16.mxu1 %v1013_v2  ;;  %v1022_v8 = vld [vmem:[#allocation5 + $0x44] ss:$8 sps:$4 sm:$0xff]   ;;  %v1024_v9 = vld [vmem:[#allocation5 + $0x40] ss:$8 sps:$4 sm:$0xff]   ;;  %v1025_v10 = vld [vmem:[#allocation5 + $0x54] ss:$8 sps:$4 sm:$0xff]  }
  0x6d   : > { %v1027_v11 = vld [vmem:[#allocation5 + $0x50] ss:$8 sps:$4 sm:$0xff]   ;;  %v1028_v12 = vld [vmem:[#allocation5 + $0x64] ss:$8 sps:$4 sm:$0xff]   ;;  %v1030_v14 = vld [vmem:[#allocation5 + $0x60] ss:$8 sps:$4 sm:$0xff]  }
  0x6e   : > { %v1060_v13 = vld [vmem:[%s1502_s5 + $0x4] ss:$8 sps:$4 sm:$0xff]   ;;  %v1031_v16 = vld [vmem:[#allocation5 + $0x74] ss:$8 sps:$4 sm:$0xff]   ;;  %v1033_v17 = vld [vmem:[#allocation5 + $0x70] ss:$8 sps:$4 sm:$0xff]  }
  0x6f   : > { %478 = vmatpush1.bf16.msra.mxu0 %v1015_v3  ;;  %924 = vmatpush1.bf16.msra.mxu1 %v1015_v3  ;;  %v1063_v15 = vld [vmem:[%s1502_s5 + $0x24] ss:$8 sps:$4 sm:$0xff]   ;;  %v1036_v19 = vld [vmem:[#allocation5 + $0x80] ss:$8 sps:$4 sm:$0xff]   ;;  %v1037_v20 = vld [vmem:[#allocation5 + $0x94] ss:$8 sps:$4 sm:$0xff]  }
  0x70   : > { %479 = vmatprep.subr.bf16.mxu0 %v1016_v4  ;;  %909 = vmatprep.subr.bf16.mxu1 %v1016_v4  ;;  %v1034_v18 = vld [vmem:[#allocation5 + $0x84] ss:$8 sps:$4 sm:$0xff]   ;;  %v1039_v21 = vld [vmem:[#allocation5 + $0x90] ss:$8 sps:$4 sm:$0xff]   ;;  %v1042_v23 = vld [vmem:[#allocation5 + $0xa0] ss:$8 sps:$4 sm:$0xff]  }
  0x71   : > { %507 = vmatprep.mubr.bf16.mxu0 %v1060_v13  ;;  %527 = vmatprep.mubr.bf16.mxu1 %v1063_v15  ;;  %v1040_v22 = vld [vmem:[#allocation5 + $0xa4] ss:$8 sps:$4 sm:$0xff]   ;;  %v1043_v24 = vld [vmem:[#allocation5 + $0xb4] ss:$8 sps:$4 sm:$0xff]   ;;  %v1045_v25 = vld [vmem:[#allocation5 + $0xb0] ss:$8 sps:$4 sm:$0xff]  }
  0x72   : > { %v1046_v26 = vld [vmem:[#allocation5 + $0xc4] ss:$8 sps:$4 sm:$0xff]   ;;  %v1048_v27 = vld [vmem:[#allocation5 + $0xc0] ss:$8 sps:$4 sm:$0xff]   ;;  %v1049_v28 = vld [vmem:[#allocation5 + $0xd4] ss:$8 sps:$4 sm:$0xff]  }
  0x73   : > { %480 = vmatpush1.bf16.msra.mxu0 %v1018_v5  ;;  %925 = vmatpush1.bf16.msra.mxu1 %v1018_v5  ;;  %v1051_v29 = vld [vmem:[#allocation5 + $0xd0] ss:$8 sps:$4 sm:$0xff]   ;;  %v1052_v30 = vld [vmem:[#allocation5 + $0xe4] ss:$8 sps:$4 sm:$0xff]   ;;  %v1054_v31 = vld [vmem:[#allocation5 + $0xe0] ss:$8 sps:$4 sm:$0xff]  }
  0x74   : > { %481 = vmatprep.subr.bf16.mxu0 %v1019_v6  ;;  %910 = vmatprep.subr.bf16.mxu1 %v1019_v6  ;;  %v1055_v32 = vld [vmem:[#allocation5 + $0xf4] ss:$8 sps:$4 sm:$0xff]   ;;  %v1057_v33 = vld [vmem:[#allocation5 + $0xf0] ss:$8 sps:$4 sm:$0xff]   ;;  %v1058_v34 = vld [vmem:[%s1502_s5] ss:$8 sps:$4 sm:$0xff]  }
  0x75   : > { %v1061_v35 = vld [vmem:[%s1502_s5 + $0x20] ss:$8 sps:$4 sm:$0xff]   ;;  %v1064_v36 = vld [vmem:[%s1502_s5 + $0x14] ss:$8 sps:$4 sm:$0xff]   ;;  %v1068_v38 = vld [vmem:[%s1502_s5 + $0x10] ss:$8 sps:$4 sm:$0xff]  }
  0x76   : > { %v1066_v37 = vld [vmem:[%s1502_s5 + $0x34] ss:$8 sps:$4 sm:$0xff]   ;;  %v1069_v39 = vld [vmem:[%s1502_s5 + $0x30] ss:$8 sps:$4 sm:$0xff]   ;;  %v266_v41 = vshrl.u32 %v265_v40, 7  ;;  %s836_s18 = sshll.u32 %s1498_s29, 4 }
  0x77   : > { %482 = vmatpush1.bf16.msra.mxu0 %v1021_v7  ;;  %926 = vmatpush1.bf16.msra.mxu1 %v1021_v7  ;;  %v219_v43 = vld [vmem:[#allocation7] ss:$4 sm:$0x3]  ;;  %s216_s20 = scalar_lea.vmem [#allocation8], %s836_s18  ;;  %s906_s7 = sshll.u32 %s1341_s16, 8 }
  0x78   : > { %483 = vmatprep.subr.bf16.mxu0 %v1022_v8  ;;  %911 = vmatprep.subr.bf16.mxu1 %v1022_v8  ;;  %v1520_v42 = vsub.s32 0, %v266_v41  ;;  %v1522_v44 = vsub.s32 1, %v266_v41  ;;  %s731_s8 = sshll.u32 %s216_s20, 4  ;;  %s1619_s28 = scalar_lea.hbm %s1668_s3, %s906_s7  ;;  %s1621_s8 = int_to_ptr.vmem [resolvable:$true] %s731_s8 }
  0x79   : > { %s717_s22 = scalar_lea.sflag [#allocation4], %s1498_s29  ;;  %s1220_s11 = scalar_lea.vmem %s1621_s8, 256 }
  0x7a   : > { %v1525_v45 = vrot.slane %v219_v43, %v1520_v42  ;;  %v1528_v46 = vrot.slane %v219_v43, %v1522_v44  ;;  %p1221_p11 = scmp.ne.s32.totalorder %s1621_s8, %s1220_s11  ;;  %p1682_p0 = scmp.ne.s32.totalorder %s1677_s6, 0 }
  0x7b   : > { %484 = vmatpush1.bf16.msra.mxu0 %v1024_v9  ;;  %927 = vmatpush1.bf16.msra.mxu1 %v1024_v9  ;;  %s1297_s16 = smov [#allocation8]  }
  0x7c   : > { %485 = vmatprep.subr.bf16.mxu0 %v1025_v10  ;;  %912 = vmatprep.subr.bf16.mxu1 %v1025_v10  ;;  %p1222_p2 = pnand %p1221_p11, %p1682_p0  ;;  %s1224_s25 = sshll.u32 %s1297_s16, 4  ;;  %s1225_s25 = int_to_ptr.vmem [resolvable:$false] %s1224_s25 }
  0x7d   : > { %s1226_s10 = scalar_lea.vmem %s1225_s25, 512  ;;  %p1227_p7 = scmp.lt.s32.totalorder %s1621_s8, %s1225_s25 }
  0x7e   : > { %p1223_p3 = pneg %p1222_p2  ;;  %p1228_p9 = scmp.lt.s32.totalorder %s1226_s10, %s1220_s11 }
  0x7f   : > { %486 = vmatpush1.bf16.msra.mxu0 %v1027_v11  ;;  %928 = vmatpush1.bf16.msra.mxu1 %v1027_v11 }
  0x80   : > { %487 = vmatprep.subr.bf16.mxu0 %v1028_v12  ;;  %913 = vmatprep.subr.bf16.mxu1 %v1028_v12  ;;  %p1229_p12 = por %p1228_p9, %p1227_p7 }
  0x82   : > { %p1230_p1 = pnand %p1229_p12, %p1223_p3 }
  0x83   : > { %488 = vmatpush1.bf16.msra.mxu0 %v1030_v14  ;;  %929 = vmatpush1.bf16.msra.mxu1 %v1030_v14 }
  0x84   : > { %489 = vmatprep.subr.bf16.mxu0 %v1031_v16  ;;  %914 = vmatprep.subr.bf16.mxu1 %v1031_v16 }
  0x87   : > { %490 = vmatpush1.bf16.msra.mxu0 %v1033_v17  ;;  %930 = vmatpush1.bf16.msra.mxu1 %v1033_v17 }
  0x88   : > { %491 = vmatprep.subr.bf16.mxu0 %v1034_v18  ;;  %915 = vmatprep.subr.bf16.mxu1 %v1034_v18 }
  0x8b   : > { %492 = vmatpush1.bf16.msra.mxu0 %v1036_v19  ;;  %931 = vmatpush1.bf16.msra.mxu1 %v1036_v19 }
  0x8c   : > { %493 = vmatprep.subr.bf16.mxu0 %v1037_v20  ;;  %916 = vmatprep.subr.bf16.mxu1 %v1037_v20 }
  0x8f   : > { %494 = vmatpush1.bf16.msra.mxu0 %v1039_v21  ;;  %932 = vmatpush1.bf16.msra.mxu1 %v1039_v21 }
  0x90   : > { %495 = vmatprep.subr.bf16.mxu0 %v1040_v22  ;;  %917 = vmatprep.subr.bf16.mxu1 %v1040_v22 }
  0x93   : > { %496 = vmatpush1.bf16.msra.mxu0 %v1042_v23  ;;  %933 = vmatpush1.bf16.msra.mxu1 %v1042_v23 }
  0x94   : > { %497 = vmatprep.subr.bf16.mxu0 %v1043_v24  ;;  %918 = vmatprep.subr.bf16.mxu1 %v1043_v24 }
  0x97   : > { %498 = vmatpush1.bf16.msra.mxu0 %v1045_v25  ;;  %934 = vmatpush1.bf16.msra.mxu1 %v1045_v25 }
  0x98   : > { %499 = vmatprep.subr.bf16.mxu0 %v1046_v26  ;;  %919 = vmatprep.subr.bf16.mxu1 %v1046_v26 }
  0x9b   : > { %500 = vmatpush1.bf16.msra.mxu0 %v1048_v27  ;;  %935 = vmatpush1.bf16.msra.mxu1 %v1048_v27 }
  0x9c   : > { %501 = vmatprep.subr.bf16.mxu0 %v1049_v28  ;;  %920 = vmatprep.subr.bf16.mxu1 %v1049_v28 }
  0x9f   : > { %502 = vmatpush1.bf16.msra.mxu0 %v1051_v29  ;;  %936 = vmatpush1.bf16.msra.mxu1 %v1051_v29 }
  0xa0   : > { %503 = vmatprep.subr.bf16.mxu0 %v1052_v30  ;;  %921 = vmatprep.subr.bf16.mxu1 %v1052_v30 }
  0xa3   : > { %504 = vmatpush1.bf16.msra.mxu0 %v1054_v31  ;;  %937 = vmatpush1.bf16.msra.mxu1 %v1054_v31 }
  0xa4   : > { %505 = vmatprep.subr.bf16.mxu0 %v1055_v32  ;;  %922 = vmatprep.subr.bf16.mxu1 %v1055_v32 }
  0xa7   : > { %506 = vmatpush1.bf16.msra.mxu0 %v1057_v33  ;;  %938 = vmatpush1.bf16.msra.mxu1 %v1057_v33 }
  0xaa   : > { %508 = vmatmul.mubr.bf16.vlgmr.msra.gmra.mrb[0].mxu0 %v1058_v34  ;;  %528 = vmatmul.mubr.bf16.vlgmr.msra.gmra.mrb[0].mxu1 %v1061_v35 }
  0xab   : > { %517 = vmatprep.mubr.bf16.mxu0 %v1064_v36  ;;  %537 = vmatprep.mubr.bf16.mxu1 %v1066_v37 }
  0xb2   : > { %518 = vmatmul.mubr.bf16.gmra.mrb[4].mxu0 %v1068_v38  ;;  %538 = vmatmul.mubr.bf16.gmra.mrb[4].mxu1 %v1069_v39 }
 0x17d   : > { %v509_v47 = vpop.f32.mrb[0].mxu0  ;;  %v529_v48 = vpop.f32.mrb[0].mxu1 }
 0x17e   : > { %v1531_v49 = vadd.f32 %v509_v47, %v1525_v45  ;;  %v1534_v50 = vadd.f32 %v529_v48, %v1525_v45  ;;  %v511_v51 = vpop.f32.mrb[1].mxu0  ;;  %v531_v52 = vpop.f32.mrb[1].mxu1 }
 0x17f   : > { %v1537_v53 = vadd.f32 %v511_v51, %v1528_v46  ;;  %v1540_v54 = vadd.f32 %v531_v52, %v1528_v46  ;;  %v513_v55 = vpop.f32.mrb[2].mxu0  ;;  %v533_v56 = vpop.f32.mrb[2].mxu1 }
 0x180   : > { %v877_v57 = vmul.f32 -1.442695, %v1531_v49  ;;  %v885_v58 = vmul.f32 -1.442695, %v1534_v50  ;;  %v1545_v59 = vadd.f32 %v513_v55, %v1525_v45  ;;  %v1548_v60 = vadd.f32 %v533_v56, %v1525_v45  ;;  %v515_v61 = vpop.f32.mrb[3].mxu0  ;;  %v535_v62 = vpop.f32.mrb[3].mxu1 }
 0x181   : > { %v878_v63 = vmul.f32 -1.442695, %v1537_v53  ;;  %v886_v0 = vmul.f32 -1.442695, %v1540_v54  ;;  %v1561_v9 = vadd.f32 %v515_v61, %v1528_v46  ;;  %v1570_v14 = vadd.f32 %v535_v62, %v1528_v46 }
 0x182   : > { %1070 = vpow2.f32 %v877_v57  ;;  %v879_v1 = vmul.f32 -1.442695, %v1545_v59  ;;  %v887_v2 = vmul.f32 -1.442695, %v1548_v60 }
 0x183   : > { %1072 = vpow2.f32 %v885_v58  ;;  %v880_v23 = vmul.f32 -1.442695, %v1561_v9  ;;  %v888_v25 = vmul.f32 -1.442695, %v1570_v14 }
 0x184   : > { %1074 = vpow2.f32 %v878_v63 }
 0x185   : > { %1076 = vpow2.f32 %v886_v0  ;;  %v519_v3 = vpop.f32.mrb[4].mxu0  ;;  %v539_v4 = vpop.f32.mrb[4].mxu1 }
 0x186   : > { %1078 = vpow2.f32 %v879_v1  ;;  %v1555_v5 = vadd.f32 %v519_v3, %v1525_v45  ;;  %v1558_v6 = vadd.f32 %v539_v4, %v1525_v45  ;;  %v521_v7 = vpop.f32.mrb[5].mxu0  ;;  %v541_v8 = vpop.f32.mrb[5].mxu1 }
 0x187   : > { %1080 = vpow2.f32 %v887_v2  ;;  %v1564_v10 = vadd.f32 %v521_v7, %v1528_v46  ;;  %v1567_v11 = vadd.f32 %v541_v8, %v1528_v46  ;;  %v523_v12 = vpop.f32.mrb[6].mxu0  ;;  %v543_v13 = vpop.f32.mrb[6].mxu1  ;;  %v221_v7 = vld [vmem:[#allocation7 + $0x1] ss:$4 sm:$0x3] }
 0x188   : > { %v881_v15 = vmul.f32 -1.442695, %v1555_v5  ;;  %v889_v16 = vmul.f32 -1.442695, %v1558_v6  ;;  %v1575_v17 = vadd.f32 %v523_v12, %v1525_v45  ;;  %v525_v18 = vpop.f32.mrb[7].mxu0  ;;  %v545_v19 = vpop.f32.mrb[7].mxu1  ;;  %v1583_v38 = vadd.f32 %v543_v13, %v1525_v45 }
 0x189   : > { %v882_v20 = vmul.f32 -1.442695, %v1564_v10  ;;  %v890_v21 = vmul.f32 -1.442695, %v1567_v11  ;;  %v1586_v41 = vadd.f32 %v525_v18, %v1528_v46  ;;  %v1589_v48 = vadd.f32 %v545_v19, %v1528_v46 }
 0x18a   : > { %1082 = vpow2.f32 %v881_v15  ;;  %v883_v22 = vmul.f32 -1.442695, %v1575_v17  ;;  %v891_v45 = vmul.f32 -1.442695, %v1583_v38 }
 0x18b   : > { %1084 = vpow2.f32 %v889_v16  ;;  %v884_v61 = vmul.f32 -1.442695, %v1586_v41  ;;  %v892_v63 = vmul.f32 -1.442695, %v1589_v48 }
 0x18c   : > { %v1071_v24 = vpop.eup %1070  ;;  %1086 = vpow2.f32 %v882_v20  ;;  %v223_v8 = vld [vmem:[#allocation7 + $0x2] ss:$4 sm:$0x3] }
 0x18d   : > { %v1073_v26 = vpop.eup %1072  ;;  %v596_v27 = vadd.f32 1.0, %v1071_v24  ;;  %1088 = vpow2.f32 %v890_v21  ;;  %v676_v21 = vrot.slane %v221_v7, %v1520_v42 }
 0x18e   : > { %v1075_v28 = vpop.eup %1074  ;;  %v604_v29 = vadd.f32 1.0, %v1073_v26  ;;  %1090 = vpow2.f32 %v883_v22  ;;  %v691_v22 = vrot.slane %v223_v8, %v1520_v42 }
 0x18f   : > { %v1077_v30 = vpop.eup %1076  ;;  %v597_v31 = vadd.f32 1.0, %v1075_v28  ;;  %1092 = vpow2.f32 %v880_v23 }
 0x190   : > { %v1079_v32 = vpop.eup %1078  ;;  %v605_v33 = vadd.f32 1.0, %v1077_v30  ;;  %1094 = vpow2.f32 %v888_v25 }
 0x191   : > { %v1081_v34 = vpop.eup %1080  ;;  %1096 = vrcp.f32 %v596_v27  ;;  %v598_v35 = vadd.f32 1.0, %v1079_v32 }
 0x192   : > { %1098 = vrcp.f32 %v604_v29  ;;  %v606_v36 = vadd.f32 1.0, %v1081_v34 }
 0x193   : > { %1100 = vrcp.f32 %v597_v31 }
 0x194   : > { %v1083_v37 = vpop.eup %1082  ;;  %1102 = vrcp.f32 %v605_v33 }
 0x195   : > { %v1085_v39 = vpop.eup %1084  ;;  %1104 = vrcp.f32 %v598_v35  ;;  %v600_v40 = vadd.f32 1.0, %v1083_v37 }
 0x196   : > { %v1087_v43 = vpop.eup %1086  ;;  %1106 = vrcp.f32 %v606_v36  ;;  %v608_v47 = vadd.f32 1.0, %v1085_v39  ;;  %v695_v39 = vrot.slane %v223_v8, %v1522_v44 }
 0x197   : > { %v1089_v51 = vpop.eup %1088  ;;  %1108 = vrcp.f32 %v600_v40  ;;  %v601_v52 = vadd.f32 1.0, %v1087_v43 }
 0x198   : > { %v1091_v55 = vpop.eup %1090  ;;  %1110 = vrcp.f32 %v608_v47  ;;  %v609_v56 = vadd.f32 1.0, %v1089_v51 }
 0x199   : > { %v1093_v57 = vpop.eup %1092  ;;  %1112 = vrcp.f32 %v601_v52  ;;  %v602_v58 = vadd.f32 1.0, %v1091_v55 }
 0x19a   : > { %v1095_v62 = vpop.eup %1094  ;;  %1114 = vrcp.f32 %v609_v56  ;;  %v599_v13 = vadd.f32 1.0, %v1093_v57 }
 0x19b   : > { %v1097_v0 = vpop.eup %1096  ;;  %1116 = vrcp.f32 %v602_v58  ;;  %v607_v20 = vadd.f32 1.0, %v1095_v62 }
 0x19c   : > { %v1099_v46 = vpop.eup %1098  ;;  %1118 = vpow2.f32 %v891_v45  ;;  %v644_v16 = vmul.f32 %v1097_v0, %v1531_v49 }
 0x19d   : > { %v1101_v1 = vpop.eup %1100  ;;  %1120 = vpow2.f32 %v884_v61  ;;  %v652_v24 = vmul.f32 %v1099_v46, %v1534_v50 }
 0x19e   : > { %v1103_v2 = vpop.eup %1102  ;;  %1122 = vpow2.f32 %v892_v63  ;;  %v645_v25 = vmul.f32 %v1101_v1, %v1537_v53 }
 0x19f   : > { %v1105_v3 = vpop.eup %1104  ;;  %v653_v29 = vmul.f32 %v1103_v2, %v1540_v54  ;;  %1124 = vrcp.f32 %v599_v13 }
 0x1a0   : > { %v1107_v4 = vpop.eup %1106  ;;  %v646_v49 = vmul.f32 %v1105_v3, %v1545_v59  ;;  %1126 = vrcp.f32 %v607_v20 }
 0x1a1   : > { %v1109_v12 = vpop.eup %1108  ;;  %v654_v53 = vmul.f32 %v1107_v4, %v1548_v60 }
 0x1a2   : > { %v1111_v15 = vpop.eup %1110  ;;  %v648_v18 = vmul.f32 %v1109_v12, %v1555_v5  ;;  %v680_v5 = vrot.slane %v221_v7, %v1522_v44 }
 0x1a3   : > { %v1113_v19 = vpop.eup %1112  ;;  %v656_v31 = vmul.f32 %v1111_v15, %v1558_v6 }
 0x1a4   : > { %v1115_v23 = vpop.eup %1114  ;;  %v660_v26 = vadd.f32 %v648_v18, %v644_v16  ;;  %v649_v27 = vmul.f32 %v1113_v19, %v1564_v10 }
 0x1a5   : > { %v1117_v28 = vpop.eup %1116  ;;  %v657_v10 = vmul.f32 %v1115_v23, %v1567_v11 }
 0x1a6   : > { %v1119_v30 = vpop.eup %1118  ;;  %v661_v42 = vadd.f32 %v660_v26, %v652_v24  ;;  %v663_v32 = vadd.f32 %v649_v27, %v645_v25  ;;  %v650_v50 = vmul.f32 %v1117_v28, %v1575_v17 }
 0x1a7   : > { %v1121_v33 = vpop.eup %1120  ;;  %v610_v54 = vadd.f32 1.0, %v1119_v30 }
 0x1a8   : > { %v1123_v34 = vpop.eup %1122  ;;  %v662_v59 = vadd.f32 %v661_v42, %v656_v31  ;;  %v664_v35 = vadd.f32 %v663_v32, %v653_v29  ;;  %v666_v36 = vadd.f32 %v650_v50, %v646_v49  ;;  %v603_v37 = vadd.f32 1.0, %v1121_v33 }
 0x1a9   : > { %1128 = vrcp.f32 %v610_v54  ;;  %v611_v6 = vadd.f32 1.0, %v1123_v34  ;;  %v1125_v11 = vpop.eup %1124 }
 0x1aa   : > { %v683_v40 = vmul.f32 %v676_v21, %v662_v59  ;;  %v665_v43 = vadd.f32 %v664_v35, %v657_v10  ;;  %v667_v17 = vadd.f32 %v666_v36, %v654_v53  ;;  %1130 = vrcp.f32 %v603_v37  ;;  %v1127_v55 = vpop.eup %1126 }
 0x1ab   : > { %1132 = vrcp.f32 %v611_v6  ;;  %v647_v57 = vmul.f32 %v1125_v11, %v1561_v9  ;;  %v655_v63 = vmul.f32 %v1127_v55, %v1570_v14 }
 0x1ac   : > { %v698_v47 = vadd.f32 %v691_v22, %v683_v40  ;;  %v684_v60 = vmul.f32 %v680_v5, %v665_v43 }
 0x1ae   : > { %v699_v51 = vadd.f32 %v695_v39, %v684_v60 }
 0x1b0   : > { %v903_v52 = vpack.c.bf16 %v699_v51, %v698_v47 }
 0x1b2   : > { %714 = vst [vmem:[%s216_s20] sm:$0xff] %v903_v52 }
 0x1b3   : > { %v1129_v56 = vpop.eup %1128 }
 0x1b4   : > { %v1131_v45 = vpop.eup %1130  ;;  %v658_v44 = vmul.f32 %v1129_v56, %v1583_v38 }
 0x1b5   : > { %v651_v58 = vmul.f32 %v1131_v45, %v1586_v41  ;;  %v1133_v61 = vpop.eup %1132 }
 0x1b6   : > { %v668_v62 = vadd.f32 %v667_v17, %v658_v44  ;;  %v659_v1 = vmul.f32 %v1133_v61, %v1589_v48 }
 0x1b7   : > { %v669_v0 = vadd.f32 %v651_v58, %v647_v57 }
 0x1b8   : > { %v685_v46 = vmul.f32 %v676_v21, %v668_v62 }
 0x1b9   : > { %v670_v2 = vadd.f32 %v669_v0, %v655_v63 }
 0x1ba   : > { %v700_v4 = vadd.f32 %v691_v22, %v685_v46 }
 0x1bb   : > { %v671_v3 = vadd.f32 %v670_v2, %v659_v1 }
 0x1bd   : > { %v686_v7 = vmul.f32 %v680_v5, %v671_v3 }
 0x1bf   : > { %v701_v38 = vadd.f32 %v695_v39, %v686_v7 }
 0x1c1   : > { %v904_v9 = vpack.c.bf16 %v701_v38, %v700_v4 }
 0x1c3   : > { %715 = vst [vmem:[%s216_s20 + $0x8] sm:$0xff] %v904_v9 }
 0x1c4   : > { %1233 = shalt.err (!%p1230_p1)
}
 0x1c5   : > { %s1234_s17 = scalar_lea.hbm %s1619_s28, 256  ;;  %s1238_s30 = scalar_lea.hbm %s1668_s3, 512 }
 0x1c6   : > { %p1235_p13 = scmp.ne.s32.totalorder %s1619_s28, %s1234_s17  ;;  %p1239_p4 = scmp.lt.u32.totalorder %s1619_s28, %s1668_s3 }
 0x1c7   : > { %p1240_p5 = scmp.lt.u32.totalorder %s1238_s30, %s1234_s17  ;;  %p1242_p11 = scmp.lt.u32.totalorder %s1234_s17, %s1619_s28 }
 0x1c8   : > { %p1236_p6 = pnand %p1235_p13, %p1682_p0 }
 0x1c9   : > { %p1241_p8 = por %p1240_p5, %p1239_p4 }
 0x1ca   : > { %p1237_p10 = pneg %p1236_p6 }
 0x1cb   : > { %p1243_p2 = por %p1242_p11, %p1241_p8 }
 0x1cd   : > { %p1244_p3 = pnand %p1243_p2, %p1237_p10 }
 0x1cf   : > { %1247 = shalt.err (!%p1244_p3)
}
 0x1d0   : > { %s1298_s18 = smov 128   ;;  %s1299_s20 = smov 8  }
 0x1d1   : > { %949 = dma.vmem_to_hbm [thread:$0]  (%p1682_p0), %s1621_s8, 256, %s1619_s28, %s717_s22, %s1298_s18, %s1298_s18, %s1299_s20  }
 0x1d2 PF: > { %s746_s7 = sand.u32 1, %s1278_s12   ;;  %p1683_p7 = scmp.ne.s32.totalorder %s1673_s19, 0 }
 0x1d3   : > { %p1684_p9 = scmp.ge.s32.totalorder %s1290_s15, 2  ;;  %s747_s24 = scalar_lea.sflag [#allocation4], %s746_s7 }
 0x1d5   : > { %p963_p12 = pnand %p1684_p9, %p1683_p7 }
 0x1d7   : > { %1273 = dma.done.wait (!%p963_p12), %s747_s24, 256  }
 0x1d8   : > { %1275 = vsyncadd (!%p963_p12), %s747_s24, 4294967040  ;;  %p17_p1 = scmp.ge.s32.totalorder %s1433_s4, 4   ;;  %s1685_s12 = smov %s1282_s13 }
 0x1d9   : > { %s1686_s13 = smov %s1286_s14  ;;  %s1687_s14 = smov %s1449_s9 }
 0x1da   : > { %s1688_s15 = smov %s1433_s4  ;;  %19 = sbr.rel (!%p17_p1) target bundleno = 6 (0x6), region = 87 }
 0x1e1   :  { %752 = vsyncpa [#allocation3], 1 }
 0x1e2   :  { %754 = vsyncpa [#allocation3 + $0x1], 1 }
 0x1e3   :  { %755 = vsyncpa [#allocation6], 1 }
 0x1e4   :  { %756 = vsyncpa [#allocation4], 1 }
 0x1e5   :  { %758 = vsyncpa [#allocation4 + $0x1], 1 }

</bundles_post_ra>
